<compile_context>
chip_gen: v5e
topology: v5e:2x2
jax: 0.10.0
libtpu: 0.0.40
codegen_flags: <defaults>
</compile_context>

<pallas_src>
import jax
import jax.numpy as jnp
from jax.experimental import pallas as pl
from jax.experimental.pallas import tpu as pltpu

NUM_CITIES = 88
NUM_YEARS = 6
STDDEVE = 0.002
STDDEVG = 0.01
STDDEVW = 0.1

_C2 = STDDEVE ** 2                      # multiplies sum(log(||G[:,i]||_1))
_C3 = STDDEVG ** 2 / STDDEVE ** 2       # multiplies ||G - w*D||_F^2
_C4 = STDDEVE ** 2 / STDDEVW ** 2       # multiplies |w^2|


def _loss_kernel(u_ref, o_ref, g_ref, d_ref, w_ref, loss_ref):
    # u_ref / o_ref : (NUM_CITIES, NUM_YEARS)   f32 in VMEM (natural layout)
    # g_ref / d_ref : (NUM_CITIES, NUM_CITIES)  f32 in VMEM
    # w_ref         : (1,) f32 in SMEM
    # loss_ref      : (1,) f32 in SMEM
    w = w_ref[0]  # scalar, stays on the scalar path

    # ---- term 1: sum_{i < num_years-1} ||U[:, i] - out[:, i]||_2^2 -----------
    # Mask the last year in-kernel instead of slicing/transposing in the wrapper.
    diff = u_ref[...] - o_ref[...]
    year = jax.lax.broadcasted_iota(jnp.int32, (NUM_CITIES, NUM_YEARS), 1)
    diff = jnp.where(year < NUM_YEARS - 1, diff, 0.0)
    d2_row = jnp.sum(diff * diff, axis=0, keepdims=True)        # (1, NUM_YEARS)

    # ---- fused sweep over G / D: terms 2, 3 and 5 (scales hoisted) -----------
    G = g_ref[...]
    r = G - w * d_ref[...]                                      # scalar w splatted once
    rr_row = jnp.sum(r * r, axis=0, keepdims=True)              # (1, NUM_CITIES)
    neg_row = jnp.sum(jnp.minimum(G, 0.0), axis=0, keepdims=True)
    col_l1 = jnp.sum(jnp.abs(G), axis=0, keepdims=True)         # (1, NUM_CITIES)
    combined = _C3 * rr_row - 1000.0 * neg_row + _C2 * jnp.log(col_l1)

    # ---- term 4: |w^2| * (stddeve^2 / stddevw^2)  (pure scalar) --------------
    t4 = jnp.abs(w * w) * _C4

    # One cross-lane reduce over the combined (1, 88) row + one single-vreg
    # (1, 6) lane reduce for the U/out term.
    loss_ref[0] = jnp.sum(combined) + jnp.sum(d2_row) + t4


@jax.jit
def loss_forward(G, out, U, V, D, w):
    """Pallas equivalent of loss.forward(G, out, U, V, D, w).

    V is accepted for signature parity but (as in the PyTorch module) unused.
    Returns a scalar float32 loss.
    # TODO(synk): the PyTorch module's `print(loss)` / `self.loss = loss` side
    # effects have no in-kernel equivalent; the value is simply returned.
    """
    del V  # unused in the reference forward
    G = jnp.asarray(G, jnp.float32)
    D = jnp.asarray(D, jnp.float32)
    U = jnp.asarray(U, jnp.float32)
    out = jnp.asarray(out, jnp.float32)
    w_arr = jnp.asarray(w, jnp.float32).reshape((1,))

    res = pl.pallas_call(
        _loss_kernel,
        out_shape=jax.ShapeDtypeStruct((1,), jnp.float32),
        in_specs=[
            pl.BlockSpec(memory_space=pltpu.MemorySpace.VMEM),  # U  (88, 6)
            pl.BlockSpec(memory_space=pltpu.MemorySpace.VMEM),  # out (88, 6)
            pl.BlockSpec(memory_space=pltpu.MemorySpace.VMEM),  # G  (88, 88)
            pl.BlockSpec(memory_space=pltpu.MemorySpace.VMEM),  # D  (88, 88)
            pl.BlockSpec(memory_space=pltpu.MemorySpace.SMEM),  # w  scalar
        ],
        out_specs=pl.BlockSpec(memory_space=pltpu.MemorySpace.SMEM),
    )(U, out, G, D, w_arr)
    return res[0]


def loss_reference(G, out, U, V, D, w):
    """Pure-JAX reference mirroring the PyTorch forward exactly."""
    del V
    loss = jnp.sum((U[:, : NUM_YEARS - 1] - out[:, : NUM_YEARS - 1]) ** 2)
    lgg = jnp.sum(jnp.log(jnp.sum(jnp.abs(G), axis=0)))
    loss = loss + STDDEVE ** 2 * lgg
    loss = loss + jnp.sum((G - w * D) ** 2) * STDDEVG ** 2 / STDDEVE ** 2
    loss = loss + jnp.abs(w ** 2) * (STDDEVE ** 2 / STDDEVW ** 2)
    loss = loss - jnp.sum((G < 0).astype(jnp.float32) * G * 1000.0)
    return loss


if __name__ == "__main__":
    key = jax.random.PRNGKey(0)
    kG, kO, kU, kV, kD, kW = jax.random.split(key, 6)

    G = jax.random.normal(kG, (NUM_CITIES, NUM_CITIES), dtype=jnp.float32)
    out = jax.random.normal(kO, (NUM_CITIES, NUM_YEARS), dtype=jnp.float32)
    U = jax.random.normal(kU, (NUM_CITIES, NUM_YEARS), dtype=jnp.float32)
    V = jax.random.normal(kV, (NUM_CITIES, NUM_YEARS), dtype=jnp.float32)
    D = jax.random.normal(kD, (NUM_CITIES, NUM_CITIES), dtype=jnp.float32)
    w = jax.random.normal(kW, (), dtype=jnp.float32)  # scalar weight

    got = jax.block_until_ready(loss_forward(G, out, U, V, D, w))
    want = jax.block_until_ready(loss_reference(G, out, U, V, D, w))

    assert jnp.isfinite(got), "kernel produced non-finite loss"
    rel_err = abs(float(got) - float(want)) / max(1.0, abs(float(want)))
    assert rel_err < 1e-4, f"mismatch: pallas={float(got)} ref={float(want)}"

    print("KERNEL_OK")
</pallas_src>

<mosaic_0001>
module attributes {stable_mosaic.version = 11 : i64} {
  func.func @_loss_kernel(%arg0: memref<88x6xf32, #tpu.memory_space<vmem>>, %arg1: memref<88x6xf32, #tpu.memory_space<vmem>>, %arg2: memref<88x88xf32, #tpu.memory_space<vmem>>, %arg3: memref<88x88xf32, #tpu.memory_space<vmem>>, %arg4: memref<1xf32, #tpu.memory_space<smem>>, %arg5: memref<1xf32, #tpu.memory_space<smem>>) attributes {dimension_semantics = [], scalar_prefetch = 0 : i64, scratch_operands = 0 : i64, tpu.core_type = #tpu.core_type<tc>} {
    %c0 = arith.constant 0 : index
    %0 = memref.load %arg4[%c0] : memref<1xf32, #tpu.memory_space<smem>>
    %c0_0 = arith.constant 0 : index
    %c0_1 = arith.constant 0 : index
    %1 = vector.load %arg0[%c0_0, %c0_1] : memref<88x6xf32, #tpu.memory_space<vmem>>, vector<88x6xf32>
    %c0_2 = arith.constant 0 : index
    %c0_3 = arith.constant 0 : index
    %2 = vector.load %arg1[%c0_2, %c0_3] : memref<88x6xf32, #tpu.memory_space<vmem>>, vector<88x6xf32>
    %3 = arith.subf %1, %2 : vector<88x6xf32>
    %4 = tpu.iota {dimensions = array<i32: 1>} : vector<88x6xi32>
    %c5_i32 = arith.constant 5 : i32
    %5 = vector.broadcast %c5_i32 : i32 to vector<88x6xi32>
    %6 = arith.cmpi slt, %4, %5 : vector<88x6xi32>
    %cst = arith.constant 0.000000e+00 : f32
    %7 = vector.broadcast %cst : f32 to vector<88x6xf32>
    %8 = arith.select %6, %3, %7 : vector<88x6xi1>, vector<88x6xf32>
    %9 = arith.mulf %8, %8 : vector<88x6xf32>
    %cst_4 = arith.constant dense<0.000000e+00> : vector<6xf32>
    %10 = vector.multi_reduction <add>, %9, %cst_4 [0] : vector<88x6xf32> to vector<6xf32>
    %11 = vector.shape_cast %10 : vector<6xf32> to vector<1x6xf32>
    %c0_5 = arith.constant 0 : index
    %c0_6 = arith.constant 0 : index
    %12 = vector.load %arg2[%c0_5, %c0_6] : memref<88x88xf32, #tpu.memory_space<vmem>>, vector<88x88xf32>
    %c0_7 = arith.constant 0 : index
    %c0_8 = arith.constant 0 : index
    %13 = vector.load %arg3[%c0_7, %c0_8] : memref<88x88xf32, #tpu.memory_space<vmem>>, vector<88x88xf32>
    %14 = vector.broadcast %0 : f32 to vector<88x88xf32>
    %15 = arith.mulf %14, %13 : vector<88x88xf32>
    %16 = arith.subf %12, %15 : vector<88x88xf32>
    %17 = arith.mulf %16, %16 : vector<88x88xf32>
    %cst_9 = arith.constant dense<0.000000e+00> : vector<88xf32>
    %18 = vector.multi_reduction <add>, %17, %cst_9 [0] : vector<88x88xf32> to vector<88xf32>
    %19 = vector.shape_cast %18 : vector<88xf32> to vector<1x88xf32>
    %cst_10 = arith.constant 0.000000e+00 : f32
    %20 = vector.broadcast %cst_10 : f32 to vector<88x88xf32>
    %21 = arith.minimumf %12, %20 : vector<88x88xf32>
    %cst_11 = arith.constant dense<0.000000e+00> : vector<88xf32>
    %22 = vector.multi_reduction <add>, %21, %cst_11 [0] : vector<88x88xf32> to vector<88xf32>
    %23 = vector.shape_cast %22 : vector<88xf32> to vector<1x88xf32>
    %24 = math.absf %12 : vector<88x88xf32>
    %cst_12 = arith.constant dense<0.000000e+00> : vector<88xf32>
    %25 = vector.multi_reduction <add>, %24, %cst_12 [0] : vector<88x88xf32> to vector<88xf32>
    %26 = vector.shape_cast %25 : vector<88xf32> to vector<1x88xf32>
    %cst_13 = arith.constant 2.500000e+01 : f32
    %27 = vector.broadcast %cst_13 : f32 to vector<1x88xf32>
    %28 = arith.mulf %27, %19 : vector<1x88xf32>
    %cst_14 = arith.constant 1.000000e+03 : f32
    %29 = vector.broadcast %cst_14 : f32 to vector<1x88xf32>
    %30 = arith.mulf %29, %23 : vector<1x88xf32>
    %31 = arith.subf %28, %30 : vector<1x88xf32>
    %32 = math.log %26 : vector<1x88xf32>
    %cst_15 = arith.constant 4.000000e-06 : f32
    %33 = vector.broadcast %cst_15 : f32 to vector<1x88xf32>
    %34 = arith.mulf %33, %32 : vector<1x88xf32>
    %35 = arith.addf %31, %34 : vector<1x88xf32>
    %36 = arith.mulf %0, %0 : f32
    %37 = math.absf %36 : f32
    %cst_16 = arith.constant 4.000000e-04 : f32
    %38 = arith.mulf %37, %cst_16 : f32
    %39 = vector.shape_cast %35 : vector<1x88xf32> to vector<1x1x88xf32>
    %cst_17 = arith.constant dense<0.000000e+00> : vector<1xf32>
    %40 = vector.multi_reduction <add>, %39, %cst_17 [1, 2] : vector<1x1x88xf32> to vector<1xf32>
    %41 = vector.shape_cast %40 : vector<1xf32> to vector<1x1x1xf32>
    %42 = vector.extract %41[0, 0, 0] : f32 from vector<1x1x1xf32>
    %43 = vector.shape_cast %11 : vector<1x6xf32> to vector<1x1x6xf32>
    %cst_18 = arith.constant dense<0.000000e+00> : vector<1xf32>
    %44 = vector.multi_reduction <add>, %43, %cst_18 [1, 2] : vector<1x1x6xf32> to vector<1xf32>
    %45 = vector.shape_cast %44 : vector<1xf32> to vector<1x1x1xf32>
    %46 = vector.extract %45[0, 0, 0] : f32 from vector<1x1x1xf32>
    %47 = arith.addf %42, %46 : f32
    %48 = arith.addf %47, %38 : f32
    %c0_19 = arith.constant 0 : index
    %49 = memref.load %arg5[%c0_19] : memref<1xf32, #tpu.memory_space<smem>>
    memref.store %48, %arg5[%c0_19] : memref<1xf32, #tpu.memory_space<smem>>
    return
  }
}

</mosaic_0001>

<bundles_post_ra>
// kernel: loss_forward.1
= control target key start
LH: loop header
LB: loop body
LE: loop exit
PB: predicated region body
PF: predicated region fallthrough
CT: control target
= control target key end

     0   :  { %vm165_vm0 = vcmask 719872   ;;  %s638_s0 = inlined_call_operand.vmem [shape: f32[88,6], index: 0, kind: input, shape index: {}]   ;;  %s639_s1 = inlined_call_operand.vmem [shape: f32[88,6], index: 1, kind: input, shape index: {}]   ;;  %s640_s2 = inlined_call_operand.vmem [shape: f32[88,88], index: 2, kind: input, shape index: {}]   ;;  %s641_s3 = inlined_call_operand.vmem [shape: f32[88,88], index: 3, kind: input, shape index: {}]   ;;  %s642_s4 = inlined_call_operand.<no memory space> [shape: f32[1], index: 4, kind: input, shape index: {}]   ;;  %s643_s5 = inlined_call_operand.hbm [shape: f32[1], index: 5, kind: output, shape index: {}]  }
   0x1   :  { %v131_v0 = vstv %s642_s4  ;;  %v378_v1 = vld [vmem:[%s640_s2] sm:$0xff]  ;;  %v121_v3 = vld [vmem:[%s641_s3 + $0x8] sm:$0xff]  ;;  %v122_v4 = vld [vmem:[%s641_s3 + $0x10] sm:$0xff] }
   0x2   :  { %v120_v2 = vld [vmem:[%s641_s3] sm:$0xff]  ;;  %v123_v5 = vld [vmem:[%s641_s3 + $0x18] sm:$0xff]  ;;  %v125_v8 = vld [vmem:[%s641_s3 + $0x28] sm:$0xff]  ;;  %v133_v10 = vmul.f32 %v131_v0, %v121_v3  ;;  %v134_v11 = vmul.f32 %v131_v0, %v122_v4  ;;  %v193_v17 = vmin.f32 %v378_v1, 0.0 }
   0x3   :  { %v132_v6 = vmul.f32 %v131_v0, %v120_v2  ;;  %v124_v7 = vld [vmem:[%s641_s3 + $0x20] sm:$0xff]  ;;  %v126_v9 = vld [vmem:[%s641_s3 + $0x30] sm:$0xff]  ;;  %v135_v12 = vmul.f32 %v131_v0, %v123_v5  ;;  %v404_v13 = vld [vmem:[%s640_s2 + $0x8] sm:$0xff]  ;;  %v137_v20 = vmul.f32 %v131_v0, %v125_v8 }
   0x4   :  { %v409_v14 = vld [vmem:[%s640_s2 + $0x10] sm:$0xff]  ;;  %v136_v15 = vmul.f32 %v131_v0, %v124_v7  ;;  %v416_v18 = vld [vmem:[%s640_s2 + $0x18] sm:$0xff]  ;;  %v144_v21 = vsub.f32 %v404_v13, %v133_v10  ;;  %v194_v22 = vmin.f32 %v404_v13, 0.0  ;;  %v427_v24 = vld [vmem:[%s640_s2 + $0x20] sm:$0xff]  ;;  %v138_v27 = vmul.f32 %v131_v0, %v126_v9 }
   0x5   :  { %v143_v16 = vsub.f32 %v378_v1, %v132_v6  ;;  %v127_v19 = vld [vmem:[%s641_s3 + $0x38] sm:$0xff]  ;;  %v195_v23 = vmin.f32 %v409_v14, 0.0  ;;  %v432_v25 = vld [vmem:[%s640_s2 + $0x28] sm:$0xff]  ;;  %v437_v26 = vld [vmem:[%s640_s2 + $0x30] sm:$0xff]  ;;  %v145_v28 = vsub.f32 %v409_v14, %v134_v11  ;;  %v146_v29 = vsub.f32 %v416_v18, %v135_v12 }
   0x6   :  { %v196_v30 = vmin.f32 %v416_v18, 0.0  ;;  %v128_v31 = vld [vmem:[%s641_s3 + $0x40] sm:$0xff]  ;;  %v129_v32 = vld [vmem:[%s641_s3 + $0x48] sm:$0xff]  ;;  %v147_v33 = vsub.f32 %v427_v24, %v136_v15  ;;  %v197_v34 = vmin.f32 %v427_v24, 0.0  ;;  %v198_v35 = vmin.f32 %v432_v25, 0.0 }
   0x7   :  { %11 = vsyncpa [#allocation4], 0  ;;  %v139_v36 = vmul.f32 %v131_v0, %v127_v19  ;;  %v154_v37 = vmul.f32 %v143_v16, %v143_v16  ;;  %v155_v38 = vmul.f32 %v144_v21, %v144_v21  ;;  %v199_v39 = vmin.f32 %v437_v26, 0.0  ;;  %v130_v40 = vld [vmem:[%s641_s3 + $0x50] sm:$0xff]  ;;  %v462_v49 = vld [vmem:[%s640_s2 + $0x38] sm:$0xff]  ;;  %s276_s29 = smul.f32 %s642_s4, %s642_s4  ;;  %s310_s9 = sshll.u32 %s643_s5, 4  ;;  %s311_s9 = int_to_ptr.hbm [resolvable:$true] %s310_s9 }
   0x8   :  { %v148_v41 = vsub.f32 %v432_v25, %v137_v20  ;;  %v156_v42 = vmul.f32 %v145_v28, %v145_v28  ;;  %v157_v43 = vmul.f32 %v146_v29, %v146_v29  ;;  %v204_v44 = vsel %vm165_vm0, %v193_v17, 0.0  ;;  %v470_v54 = vld [vmem:[%s640_s2 + $0x40] sm:$0xff]  ;;  %v475_v55 = vld [vmem:[%s640_s2 + $0x48] sm:$0xff] }
   0x9   :  { %v140_v45 = vmul.f32 %v131_v0, %v128_v31  ;;  %v141_v46 = vmul.f32 %v131_v0, %v129_v32  ;;  %v149_v47 = vsub.f32 %v437_v26, %v138_v27  ;;  %v205_v48 = vsel %vm165_vm0, %v194_v22, 0.0  ;;  %s277_s30 = sand.u32 2147483647, %s276_s29 }
   0xa   :  { %v158_v50 = vmul.f32 %v147_v33, %v147_v33  ;;  %v166_v51 = vsel %vm165_vm0, %v154_v37, 0.0  ;;  %v167_v52 = vsel %vm165_vm0, %v155_v38, 0.0  ;;  %v169_v53 = vsel %vm165_vm0, %v156_v42, 0.0  ;;  %s278_s6 = smul.f32 0.0004, %s277_s30 }
   0xb   :  { %v142_v56 = vmul.f32 %v131_v0, %v130_v40  ;;  %v150_v57 = vsub.f32 %v462_v49, %v139_v36  ;;  %v168_v58 = vadd.f32 %v167_v52, %v166_v51  ;;  %v200_v59 = vmin.f32 %v462_v49, 0.0  ;;  %v487_v0 = vld [vmem:[%s640_s2 + $0x50] sm:$0xff]  ;;  %s341_s2 = smov [#allocation3]  }
   0xc   :  { %v159_v60 = vmul.f32 %v148_v41, %v148_v41  ;;  %v171_v61 = vsel %vm165_vm0, %v157_v43, 0.0  ;;  %v201_v62 = vmin.f32 %v470_v54, 0.0  ;;  %v202_v63 = vmin.f32 %v475_v55, 0.0 }
   0xd   :  { %v151_v2 = vsub.f32 %v470_v54, %v140_v45  ;;  %v170_v3 = vadd.f32 %v169_v53, %v168_v58  ;;  %v206_v4 = vadd.f32 %v205_v48, %v204_v44  ;;  %v207_v5 = vsel %vm165_vm0, %v195_v23, 0.0 }
   0xe   :  { %v152_v6 = vsub.f32 %v475_v55, %v141_v46  ;;  %v160_v7 = vmul.f32 %v149_v47, %v149_v47  ;;  %v173_v8 = vsel %vm165_vm0, %v158_v50, 0.0  ;;  %v209_v9 = vsel %vm165_vm0, %v196_v30, 0.0 }
   0xf   :  { %v153_v10 = vsub.f32 %v487_v0, %v142_v56  ;;  %v161_v11 = vmul.f32 %v150_v57, %v150_v57  ;;  %v172_v12 = vadd.f32 %v171_v61, %v170_v3  ;;  %v208_v15 = vadd.f32 %v207_v5, %v206_v4  ;;  %v25_v3 = vld [vmem:[%s638_s0 + $0x10] sm:$0xff] }
  0x10   :  { %v175_v16 = vsel %vm165_vm0, %v159_v60, 0.0  ;;  %v211_v17 = vsel %vm165_vm0, %v197_v34, 0.0  ;;  %v231_v19 = vand.u32 2147483647, %v378_v1  ;;  %v232_v20 = vand.u32 2147483647, %v404_v13 }
  0x11   :  { %v162_v21 = vmul.f32 %v151_v2, %v151_v2  ;;  %v174_v22 = vadd.f32 %v173_v8, %v172_v12  ;;  %v210_v23 = vadd.f32 %v209_v9, %v208_v15  ;;  %v233_v27 = vand.u32 2147483647, %v409_v14  ;;  %v23_v60 = vld [vmem:[%s638_s0] sm:$0xff]  ;;  %v24_v2 = vld [vmem:[%s638_s0 + $0x8] sm:$0xff] }
  0x12   :  { %v163_v28 = vmul.f32 %v152_v6, %v152_v6  ;;  %v177_v29 = vsel %vm165_vm0, %v160_v7, 0.0  ;;  %v213_v30 = vsel %vm165_vm0, %v198_v35, 0.0  ;;  %v234_v31 = vand.u32 2147483647, %v416_v18  ;;  %v35_v6 = vld [vmem:[%s639_s1 + $0x8] sm:$0xff]  ;;  %v36_v7 = vld [vmem:[%s639_s1 + $0x10] sm:$0xff] }
  0x13   :  { %v164_v32 = vmul.f32 %v153_v10, %v153_v10  ;;  %v176_v33 = vadd.f32 %v175_v16, %v174_v22  ;;  %v179_v34 = vsel %vm165_vm0, %v161_v11, 0.0  ;;  %v212_v36 = vadd.f32 %v211_v17, %v210_v23  ;;  %v37_v16 = vld [vmem:[%s639_s1 + $0x18] sm:$0xff]  ;;  %v27_v22 = vld [vmem:[%s638_s0 + $0x20] sm:$0xff] }
  0x14   :  { %v215_v1 = vsel %vm165_vm0, %v199_v39, 0.0  ;;  %v235_v13 = vand.u32 2147483647, %v427_v24  ;;  %v242_v37 = vsel %vm165_vm0, %v231_v19, 0.0  ;;  %v243_v14 = vsel %vm165_vm0, %v232_v20, 0.0 }
  0x15   :  { %v178_v38 = vadd.f32 %v177_v29, %v176_v33  ;;  %v214_v40 = vadd.f32 %v213_v30, %v212_v36  ;;  %v244_v41 = vadd.f32 %v243_v14, %v242_v37  ;;  %v245_v35 = vsel %vm165_vm0, %v233_v27, 0.0  ;;  %v28_v36 = vld [vmem:[%s638_s0 + $0x28] sm:$0xff] }
  0x16   :  { %v181_v18 = vsel %vm165_vm0, %v162_v21, 0.0  ;;  %v217_v42 = vsel %vm165_vm0, %v200_v59, 0.0  ;;  %v236_v43 = vand.u32 2147483647, %v432_v25  ;;  %v247_v44 = vsel %vm165_vm0, %v234_v31, 0.0 }
  0x17   :  { %v180_v39 = vadd.f32 %v179_v34, %v178_v38  ;;  %v203_v24 = vmin.f32 %v487_v0, 0.0  ;;  %v216_v45 = vadd.f32 %v215_v1, %v214_v40  ;;  %v246_v46 = vadd.f32 %v245_v35, %v244_v41  ;;  %v39_v1 = vld [vmem:[%s639_s1 + $0x28] sm:$0xff] }
  0x18   :  { %v183_v47 = vsel %vm165_vm0, %v163_v28, 0.0  ;;  %v219_v48 = vsel %vm165_vm0, %v201_v62, 0.0  ;;  %v237_v50 = vand.u32 2147483647, %v437_v26  ;;  %v249_v51 = vsel %vm165_vm0, %v235_v13, 0.0 }
  0x19   :  { %v182_v52 = vadd.f32 %v181_v18, %v180_v39  ;;  %v218_v53 = vadd.f32 %v217_v42, %v216_v45  ;;  %v248_v56 = vadd.f32 %v247_v44, %v246_v46  ;;  %v185_v25 = vsel %vm165_vm0, %v164_v32, 0.0  ;;  %v29_v18 = vld [vmem:[%s638_s0 + $0x30] sm:$0xff]  ;;  %v41_v45 = vld [vmem:[%s639_s1 + $0x38] sm:$0xff] }
  0x1a   :  { %v221_v57 = vsel %vm165_vm0, %v202_v63, 0.0  ;;  %v238_v58 = vand.u32 2147483647, %v462_v49  ;;  %v251_v59 = vsel %vm165_vm0, %v236_v43, 0.0  ;;  %v34_v49 = vld [vmem:[%s639_s1] sm:$0xff]  ;;  %v223_v63 = vsel %vm165_vm0, %v203_v24, 0.0 }
  0x1b   :  { %v184_v61 = vadd.f32 %v183_v47, %v182_v52  ;;  %v220_v62 = vadd.f32 %v219_v48, %v218_v53  ;;  %v250_v26 = vadd.f32 %v249_v51, %v248_v56  ;;  %v239_v4 = vand.u32 2147483647, %v470_v54  ;;  %v26_v54 = vld [vmem:[%s638_s0 + $0x18] sm:$0xff]  ;;  %v40_v42 = vld [vmem:[%s639_s1 + $0x30] sm:$0xff] }
  0x1c   :  { %v253_v5 = vsel %vm165_vm0, %v237_v50, 0.0  ;;  %v56_v8 = vlaneseq  ;;  %v240_v12 = vand.u32 2147483647, %v475_v55  ;;  %v255_v15 = vsel %vm165_vm0, %v238_v58, 0.0  ;;  %v38_v55 = vld [vmem:[%s639_s1 + $0x20] sm:$0xff]  ;;  %v30_v24 = vld [vmem:[%s638_s0 + $0x38] sm:$0xff] }
  0x1d   :  { %v186_v9 = vadd.f32 %v185_v25, %v184_v61  ;;  %v222_v10 = vadd.f32 %v221_v57, %v220_v62  ;;  %v252_v11 = vadd.f32 %v251_v59, %v250_v26  ;;  %v45_v17 = vsub.f32 %v23_v60, %v34_v49  ;;  %v31_v25 = vld [vmem:[%s638_s0 + $0x40] sm:$0xff]  ;;  %v32_v62 = vld [vmem:[%s638_s0 + $0x48] sm:$0xff] }
  0x1e   :  { %v549_v19 = vand.u32 127, %v56_v8  ;;  %v46_v23 = vsub.f32 %v24_v2, %v35_v6  ;;  %v47_v27 = vsub.f32 %v25_v3, %v36_v7  ;;  %v241_v29 = vand.u32 2147483647, %v487_v0  ;;  %v42_v57 = vld [vmem:[%s639_s1 + $0x40] sm:$0xff]  ;;  %v43_v26 = vld [vmem:[%s639_s1 + $0x48] sm:$0xff] }
  0x1f   :  { %v224_v20 = vadd.f32 %v223_v63, %v222_v10  ;;  %v254_v21 = vadd.f32 %v253_v5, %v252_v11  ;;  %v187_v28 = vrot.slane %v186_v9, 4  ;;  %v257_v30 = vsel %vm165_vm0, %v239_v4, 0.0  ;;  %v33_v10 = vld [vmem:[%s638_s0 + $0x50] sm:$0xff] }
  0x20   :  { %vm58_vm1 = vcmp.lt.s32.totalorder %v549_v19, 5  ;;  %v48_v33 = vsub.f32 %v26_v54, %v37_v16  ;;  %v259_v34 = vsel %vm165_vm0, %v240_v12, 0.0  ;;  %v49_v13 = vsub.f32 %v27_v22, %v38_v55  ;;  %v44_v11 = vld [vmem:[%s639_s1 + $0x50] sm:$0xff] }
  0x21   :  { %v225_v31 = vrot.slane %v224_v20, 4  ;;  %v256_v32 = vadd.f32 %v255_v15, %v254_v21  ;;  %v59_v0 = vsel %vm58_vm1, %v45_v17, 0.0  ;;  %v60_v14 = vsel %vm58_vm1, %v46_v23, 0.0 }
  0x22   :  { %v61_v38 = vsel %vm58_vm1, %v47_v27, 0.0  ;;  %v188_v40 = vadd.f32 %v187_v28, %v186_v9  ;;  %v261_v35 = vsel %vm165_vm0, %v241_v29, 0.0  ;;  %v50_v44 = vsub.f32 %v28_v36, %v39_v1 }
  0x23   :  { %v258_v37 = vadd.f32 %v257_v30, %v256_v32  ;;  %v226_v41 = vadd.f32 %v225_v31, %v224_v20  ;;  %v62_v39 = vsel %vm58_vm1, %v48_v33, 0.0  ;;  %v70_v46 = vmul.f32 %v59_v0, %v59_v0 }
  0x24   :  { %v71_v47 = vmul.f32 %v60_v14, %v60_v14  ;;  %v72_v48 = vmul.f32 %v61_v38, %v61_v38  ;;  %v51_v51 = vsub.f32 %v29_v18, %v40_v42  ;;  %v63_v52 = vsel %vm58_vm1, %v49_v13, 0.0 }
  0x25   :  { %v260_v43 = vadd.f32 %v259_v34, %v258_v37  ;;  %vm81_vm2 = vcmask 48128   ;;  %v189_v53 = vrot.slane %v188_v40, 2  ;;  %v227_v56 = vrot.slane %v226_v41, 2 }
  0x26   :  { %v73_v58 = vmul.f32 %v62_v39, %v62_v39  ;;  %v52_v60 = vsub.f32 %v30_v24, %v41_v45  ;;  %v64_v61 = vsel %vm58_vm1, %v50_v44, 0.0  ;;  %v74_v2 = vmul.f32 %v63_v52, %v63_v52 }
  0x27   :  { %v262_v50 = vadd.f32 %v261_v35, %v260_v43  ;;  %v82_v3 = vsel %vm81_vm2, %v70_v46, 0.0  ;;  %v83_v49 = vsel %vm81_vm2, %v71_v47, 0.0  ;;  %v85_v63 = vsel %vm81_vm2, %v72_v48, 0.0 }
  0x28   :  { %v53_v5 = vsub.f32 %v31_v25, %v42_v57  ;;  %v65_v6 = vsel %vm58_vm1, %v51_v51, 0.0  ;;  %v84_v7 = vadd.f32 %v83_v49, %v82_v3  ;;  %v190_v8 = vadd.f32 %v189_v53, %v188_v40 }
  0x29   :  { %v263_v59 = vrot.slane %v262_v50, 4  ;;  %v228_v9 = vadd.f32 %v227_v56, %v226_v41  ;;  %v75_v12 = vmul.f32 %v64_v61, %v64_v61  ;;  %v87_v15 = vsel %vm81_vm2, %v73_v58, 0.0 }
  0x2a   :  { %v54_v16 = vsub.f32 %v32_v62, %v43_v26  ;;  %v66_v17 = vsel %vm58_vm1, %v52_v60, 0.0  ;;  %v86_v20 = vadd.f32 %v85_v63, %v84_v7  ;;  %v76_v21 = vmul.f32 %v65_v6, %v65_v6 }
  0x2b   :  { %v264_v4 = vadd.f32 %v263_v59, %v262_v50  ;;  %v89_v22 = vsel %vm81_vm2, %v74_v2, 0.0  ;;  %v55_v23 = vsub.f32 %v33_v10, %v44_v11  ;;  %v67_v27 = vsel %vm58_vm1, %v53_v5, 0.0 }
  0x2c   :  { %v88_v28 = vadd.f32 %v87_v15, %v86_v20  ;;  %v191_v29 = vrot.slane %v190_v8, 1  ;;  %v229_v30 = vrot.slane %v228_v9, 1  ;;  %v77_v31 = vmul.f32 %v66_v17, %v66_v17 }
  0x2d   :  { %v265_v54 = vrot.slane %v264_v4, 2  ;;  %v91_v32 = vsel %vm81_vm2, %v75_v12, 0.0  ;;  %v68_v34 = vsel %vm58_vm1, %v54_v16, 0.0  ;;  %v78_v1 = vmul.f32 %v67_v27, %v67_v27 }
  0x2e   :  { %v90_v36 = vadd.f32 %v89_v22, %v88_v28  ;;  %v93_v13 = vsel %vm81_vm2, %v76_v21, 0.0  ;;  %v69_v0 = vsel %vm58_vm1, %v55_v23, 0.0  ;;  %v192_v38 = vadd.f32 %v191_v29, %v190_v8 }
  0x2f   :  { %v266_v55 = vadd.f32 %v265_v54, %v264_v4  ;;  %v230_v40 = vadd.f32 %v229_v30, %v228_v9  ;;  %v79_v41 = vmul.f32 %v68_v34, %v68_v34  ;;  %v95_v35 = vsel %vm81_vm2, %v77_v31, 0.0 }
  0x30   :  { %v92_v14 = vadd.f32 %v91_v32, %v90_v36  ;;  %v80_v42 = vmul.f32 %v69_v0, %v69_v0  ;;  %v97_v43 = vsel %vm81_vm2, %v78_v1, 0.0  ;;  %v269_v39 = vmul.f32 25.0, %v192_v38 }
  0x31   :  { %v267_v33 = vrot.slane %v266_v55, 1  ;;  %v270_v24 = vmul.f32 1000.0, %v230_v40  ;;  %v99_v45 = vsel %vm81_vm2, %v79_v41, 0.0  ;;  %vm279_vm3 = vcmask 712704  }
  0x32   :  { %v94_v18 = vadd.f32 %v93_v13, %v92_v14  ;;  %v101_v19 = vsel %vm81_vm2, %v80_v42, 0.0  ;;  %vm290_vm4 = vcmask 40960  }
  0x33   :  { %v268_v37 = vadd.f32 %v267_v33, %v266_v55  ;;  %v271_v50 = vsub.f32 %v269_v39, %v270_v24 }
  0x34   :  { %v96_v44 = vadd.f32 %v95_v35, %v94_v18 }
  0x35   :  { %325 = vlog2.f32 %v268_v37 }
  0x36   :  { %v98_v46 = vadd.f32 %v97_v43, %v96_v44 }
  0x38   :  { %v100_v48 = vadd.f32 %v99_v45, %v98_v46 }
  0x3a   :  { %v102_v52 = vadd.f32 %v101_v19, %v100_v48 }
  0x3b   :  { %v326_v47 = vpop.eup %325 }
  0x3c   :  { %v273_v51 = vmul.f32 0.6931472, %v326_v47  ;;  %v103_v56 = vrot.slane %v102_v52, 4 }
  0x3e   :  { %v274_v53 = vmul.f32 4e-06, %v273_v51  ;;  %v104_v57 = vadd.f32 %v103_v56, %v102_v52 }
  0x40   :  { %v275_v25 = vadd.f32 %v274_v53, %v271_v50  ;;  %v105_v59 = vrot.slane %v104_v57, 2 }
  0x42   :  { %v280_v58 = vsel %vm279_vm3, %v275_v25, 0.0  ;;  %v106_v60 = vadd.f32 %v105_v59, %v104_v57 }
  0x43   :  { %281 = vadd.xlane.f32.xlu0 %v280_v58 }
  0x44   :  { %v107_v61 = vrot.slane %v106_v60, 1 }
  0x46   :  { %v108_v62 = vadd.f32 %v107_v61, %v106_v60 }
  0x48   :  { %v291_v26 = vsel %vm290_vm4, %v108_v62, 0.0 }
  0x4b   :  { %292 = vadd.xlane.f32.xlu0 %v291_v26 }
  0xb6   :  { %v282_v2 = vpop.xlane.xlu0 %281 }
  0xb7   :  { %v283_v3 = vrot.slane %v282_v2, 4 }
  0xb9   :  { %v284_v49 = vadd.f32 %v283_v3, %v282_v2 }
  0xbb   :  { %v285_v63 = vrot.slane %v284_v49, 2 }
  0xbd   :  { %v286_v4 = vadd.f32 %v285_v63, %v284_v49 }
  0xbe   :  { %v293_v5 = vpop.xlane.xlu0 %292 }
  0xbf   :  { %v287_v6 = vrot.slane %v286_v4, 1  ;;  %v294_v7 = vrot.slane %v293_v5, 4 }
  0xc1   :  { %v288_v8 = vadd.f32 %v287_v6, %v286_v4  ;;  %v295_v9 = vadd.f32 %v294_v7, %v293_v5 }
  0xc3   :  { %320 = vpush %v288_v8  ;;  %v296_v10 = vrot.slane %v295_v9, 2 }
  0xc5   :  { %v297_v11 = vadd.f32 %v296_v10, %v295_v9 }
  0xc7   :  { %v298_v12 = vrot.slane %v297_v11, 1 }
  0xc9   :  { %v299_v15 = vadd.f32 %v298_v12, %v297_v11 }
  0xcb   :  { %322 = vpush %v299_v15 }
  0xf4   :  { %s321_s7 = spop %320 }
  0xfc   :  { %s323_s10 = spop %322 }
  0xfd   :  { %s301_s11 = sadd.f32 %s323_s10, %s321_s7 }
  0xff   :  { %s302_s12 = sadd.f32 %s301_s11, %s278_s6 }
 0x101   :  { %304 = sst [smem:[#allocation3]] %s302_s12 }
 0x102   :  { %313 = dma.smem_to_hbm %s341_s2, 16, %s311_s9, [#allocation4]  }
 0x103   :  { %339 = dma.done.wait [#allocation4], 16  }
 0x104   :  { %340 = vsyncadd [#allocation4], 4294967280 }
 0x105   :  { %318 = sfence }
 0x106   :  { %319 = vsyncpa [#allocation4], 1 }

</bundles_post_ra>
